<compile_context>
chip_gen: v6e
topology: v6e:2x2x1
jax: 0.10.0
libtpu: 0.0.40
codegen_flags: <defaults>
</compile_context>

<pallas_src>
import jax
import jax.numpy as jnp
from jax.experimental import pallas as pl
from jax.experimental.pallas import tpu as pltpu


# ---------------------------------------------------------------------------
# Path 1: zero-copy squeeze — output aliased onto the input, no-op body.
# ---------------------------------------------------------------------------
def _alias_noop_kernel(x_hbm_ref, o_hbm_ref, done_ref):
    # The output HBM buffer *is* the input HBM buffer (input_output_aliases),
    # so its contents are already correct and nothing has to move.
    # One SMEM scalar store keeps the kernel body non-empty (equivalent in
    # spirit to `pltpu.touch(o_hbm_ref)`).
    del x_hbm_ref, o_hbm_ref
    done_ref[0] = jnp.int32(1)


def _aliased_squeeze(x2d):
    B, D = x2d.shape
    return pl.pallas_call(
        _alias_noop_kernel,
        out_shape=jax.ShapeDtypeStruct((B, D), x2d.dtype),
        in_specs=[pl.BlockSpec(memory_space=pl.ANY)],
        out_specs=pl.BlockSpec(memory_space=pl.ANY),
        scratch_shapes=[pltpu.SMEM((1,), jnp.int32)],
        input_output_aliases={0: 0},
        compiler_params=pltpu.CompilerParams(has_side_effects=True),
    )(x2d)


# ---------------------------------------------------------------------------
# Path 2: chunked HBM->HBM DMA copy (input preserved, no VMEM staging).
# ---------------------------------------------------------------------------
_MAX_DMAS_IN_FLIGHT = 4
_SMALL_BYTES = 1 << 20  # below ~1 MiB a single DMA; fixed overhead dominates.


def _make_dma_copy_kernel(row_bounds):
    n = len(row_bounds) - 1

    def kernel(x_hbm_ref, o_hbm_ref, copy_sems):
        copies = []
        for i in range(n):  # static Python loop: bounds known at trace time
            lo = row_bounds[i]
            size = row_bounds[i + 1] - row_bounds[i]
            cp = pltpu.make_async_copy(
                x_hbm_ref.at[pl.ds(lo, size), :],
                o_hbm_ref.at[pl.ds(lo, size), :],
                copy_sems.at[i],
            )
            cp.start()
            copies.append(cp)
        for cp in copies:
            cp.wait()

    return kernel


def _dma_copy_squeeze(x2d):
    B, D = x2d.shape
    total_bytes = B * D * jnp.dtype(x2d.dtype).itemsize
    n = 1 if total_bytes <= _SMALL_BYTES else min(_MAX_DMAS_IN_FLIGHT, B)
    row_bounds = [(i * B) // n for i in range(n + 1)]
    kernel = _make_dma_copy_kernel(row_bounds)
    return pl.pallas_call(
        kernel,
        out_shape=jax.ShapeDtypeStruct((B, D), x2d.dtype),
        in_specs=[pl.BlockSpec(memory_space=pl.ANY)],
        out_specs=pl.BlockSpec(memory_space=pl.ANY),
        scratch_shapes=[pltpu.SemaphoreType.DMA((n,))],
    )(x2d)


# ---------------------------------------------------------------------------
# Public wrapper.
# ---------------------------------------------------------------------------
def ph_token_encoder_forward(x, *, donate=True):
    """Pallas implementation of PHTokenEncoder.forward: x.squeeze(1).

    x: (B, 1, D) array.  Returns (B, D), same dtype, bit-identical data.

    donate=True  -> zero-copy: the output aliases the (reshaped) input buffer.
    donate=False -> chunked HBM->HBM DMA copy; the input array is preserved.
    """
    B, one, D = x.shape
    assert one == 1, "PHTokenEncoder expects a singleton axis at dim 1"
    # Metadata-only reshape in the wrapper (no in-kernel sublane extract).
    x2d = jnp.reshape(x, (B, D))
    if donate:
        return _aliased_squeeze(x2d)
    return _dma_copy_squeeze(x2d)


if __name__ == "__main__":
    # Module defaults: input_dim=256 (feature dim of the token). Small batch.
    B, D = 2, 256
    key = jax.random.PRNGKey(0)
    x = jax.random.normal(key, (B, 1, D), dtype=jnp.float32)

    # Reference semantics: torch's x.squeeze(1)
    ref = jnp.squeeze(x, axis=1)

    # Primary (aliased, zero-copy) path.
    out_alias = jax.block_until_ready(ph_token_encoder_forward(x, donate=True))
    assert out_alias.shape == (B, D), out_alias.shape
    assert out_alias.dtype == x.dtype
    assert bool(jnp.array_equal(out_alias, ref))

    # Fallback (HBM->HBM DMA copy) path.
    out_copy = jax.block_until_ready(ph_token_encoder_forward(x, donate=False))
    assert out_copy.shape == (B, D), out_copy.shape
    assert out_copy.dtype == x.dtype
    assert bool(jnp.array_equal(out_copy, ref))

    print("KERNEL_OK")
</pallas_src>

<mosaic_0001>
module attributes {stable_mosaic.version = 11 : i64} {
  func.func @_alias_noop_kernel(%arg0: memref<2x256xf32, #tpu.memory_space<any>>, %arg1: memref<2x256xf32, #tpu.memory_space<any>>, %arg2: memref<1xi32, #tpu.memory_space<smem>>) attributes {dimension_semantics = [], scalar_prefetch = 0 : i64, scratch_operands = 1 : i64, tpu.core_type = #tpu.core_type<tc>} {
    %c1_i32 = arith.constant 1 : i32
    %c0 = arith.constant 0 : index
    %0 = memref.load %arg2[%c0] : memref<1xi32, #tpu.memory_space<smem>>
    memref.store %c1_i32, %arg2[%c0] : memref<1xi32, #tpu.memory_space<smem>>
    return
  }
}

</mosaic_0001>

<bundles_post_ra>
// kernel: tpu_custom_call.1
= control target key start
LH: loop header
LB: loop body
LE: loop exit
PB: predicated region body
PF: predicated region fallthrough
CT: control target
= control target key end

     0   :  { %s18_s0 = inlined_call_operand.hbm [shape: f32[2,256], index: 0, kind: input, shape index: {}, may-alias: {0,1}]   ;;  %s19_s1 = inlined_call_operand.hbm [shape: f32[2,256], index: 1, kind: output, shape index: {}, may-alias: {0,1}]  }

</bundles_post_ra>
